<compile_context>
chip_gen: v7x
topology: tpu7x:2x2x1
jax: 0.10.0
libtpu: 0.0.40
codegen_flags: <defaults>
</compile_context>

<pallas_src>
import jax
import jax.numpy as jnp
from jax.experimental import pallas as pl
from jax.experimental.pallas import tpu as pltpu


# ---------------------------------------------------------------------------
# Hardware / tiling helpers
# ---------------------------------------------------------------------------
def _round_up(x, m):
    return ((x + m - 1) // m) * m


def _chip_caps():
    """Return (vmem_capacity_bytes, is_v5e) with conservative fallbacks."""
    vmem_cap = 64 << 20  # assume the smallest generation (v7x) if query fails
    try:
        info = pltpu.get_tpu_info()
        vmem_cap = int(getattr(info, "vmem_capacity_bytes", vmem_cap))
    except Exception:
        pass
    kind = ""
    try:
        kind = jax.devices()[0].device_kind.lower()
    except Exception:
        pass
    is_v5e = ("v5 lite" in kind) or ("v5e" in kind) or ("v5litepod" in kind)
    return vmem_cap, is_v5e


def _block_bytes(tm, tn, tk, n_ksteps):
    """Double-buffered per-step VMEM footprint (bf16 x/w, f32 bias/out/acc)."""
    b = 2 * (tm * tk * 2) + 2 * (tk * tn * 2) + 2 * (tn * 4) + 2 * (tm * tn * 4)
    if n_ksteps > 1:
        b += tm * tn * 4  # f32 accumulator scratch
    return b


def _choose_tm(M, max_tile):
    """Row tile: big tiles amortize the ~0.35us/step overhead and fill the MXU;
    small problems still emit >= 2 row tiles so both megacore TCs get work.
    Always a multiple of 8 (sublane)."""
    if M >= 2 * max_tile:
        tm = max_tile
    elif M >= 512:
        tm = 256
    elif M >= 256:
        tm = 128
    else:
        tm = max(8, _round_up((M + 1) // 2, 8))
    return min(tm, max_tile)


def _plan_tiles(M, K, Ep, vmem_budget, max_tile):
    """Return (tm, tn, tk).  Ep % 128 == 0; tk always divides K."""
    tm = _choose_tm(M, max_tile)

    # 1) Weight fully resident (single N / K grid step): the (K, Ep) weight is
    #    DMA'd into VMEM once and reused by every row stripe.  This is the
    #    common case on v5e/v6e (128 MiB VMEM) and removes all weight
    #    re-fetch amplification.
    if _block_bytes(tm, Ep, K, 1) <= vmem_budget:
        return tm, Ep, K

    # 2) Tile the embedding axis, keep the full K per step (lane-dense tn).
    tn_cands = [t for t in (512, 256, 128) if t <= max(max_tile, 128) and Ep % t == 0]
    for tn in tn_cands:
        if _block_bytes(tm, tn, K, 1) <= vmem_budget:
            return tm, tn, K

    # 3) Tile K as well (f32 accumulator + pl.when init/finalize), innermost
    #    "arbitrary" axis; needed for huge patch dims on v7x's 64 MiB VMEM.
    tn = tn_cands[-1]
    for tk in (2048, 1024, 512, 256, 128):
        if K % tk == 0 and _block_bytes(tm, tn, tk, K // tk) <= vmem_budget:
            return tm, tn, tk

    # TODO(synk): K has no 128-multiple divisor that fits the budget; fall back
    # to the whole K and rely on vmem_limit_bytes headroom.
    return tm, tn, K


# ---------------------------------------------------------------------------
# Pallas kernels: y = x @ w + bias
# ---------------------------------------------------------------------------
def _linear_bias_kernel(x_ref, w_ref, b_ref, o_ref):
    # Single K step: straight MXU matmul (f32 accumulation) + bias epilogue.
    acc = jnp.dot(x_ref[...], w_ref[...], preferred_element_type=jnp.float32)
    o_ref[...] = (acc + b_ref[...]).astype(o_ref.dtype)  # b_ref is (1, tn) f32


def _linear_bias_acc_kernel(x_ref, w_ref, b_ref, o_ref, acc_ref):
    # K is tiled: accumulate in f32 VMEM scratch across the innermost grid axis.
    k = pl.program_id(2)

    @pl.when(k == 0)
    def _():
        acc_ref[...] = jnp.zeros_like(acc_ref)

    acc_ref[...] += jnp.dot(x_ref[...], w_ref[...],
                            preferred_element_type=jnp.float32)

    @pl.when(k == pl.num_programs(2) - 1)
    def _():
        o_ref[...] = (acc_ref[...] + b_ref[...]).astype(o_ref.dtype)


def pallas_linear(x2d, w_p, bias2d_p, *, tm, tn, tk, vmem_limit):
    """x2d: (M, K) bf16, w_p: (K, Ep) bf16, bias2d_p: (1, Ep) f32 -> (M, Ep) f32.

    Preconditions: Ep % tn == 0, K % tk == 0, tm % 8 == 0, tn % 128 == 0.
    M may be ragged (last row tile handled by Pallas; rows are independent).
    """
    M, K = x2d.shape
    Kw, Ep = w_p.shape
    assert Kw == K
    assert Ep % tn == 0 and K % tk == 0
    assert tm % 8 == 0 and tn % 128 == 0

    mt = pl.cdiv(M, tm)
    nt = Ep // tn
    kt = K // tk

    cost = pl.CostEstimate(
        flops=2 * M * K * Ep,
        transcendentals=0,
        bytes_accessed=2 * M * K + 2 * K * Ep + 4 * Ep + 4 * M * Ep,
    )

    kernel = _linear_bias_acc_kernel if kt > 1 else _linear_bias_kernel
    scratch = [pltpu.VMEM((tm, tn), jnp.float32)] if kt > 1 else []

    return pl.pallas_call(
        kernel,
        out_shape=jax.ShapeDtypeStruct((M, Ep), jnp.float32),
        grid_spec=pltpu.PrefetchScalarGridSpec(
            num_scalar_prefetch=0,
            grid=(mt, nt, kt),
            in_specs=[
                pl.BlockSpec((tm, tk), lambda i, j, k: (i, k)),   # activation tile
                pl.BlockSpec((tk, tn), lambda i, j, k: (k, j)),   # weight stripe
                pl.BlockSpec((1, tn), lambda i, j, k: (0, j)),    # bias slice
            ],
            out_specs=pl.BlockSpec((tm, tn), lambda i, j, k: (i, j)),
            scratch_shapes=scratch,
        ),
        compiler_params=pltpu.CompilerParams(
            dimension_semantics=("parallel", "parallel", "arbitrary"),
            vmem_limit_bytes=vmem_limit,
            # Let XLA fuse the patch rearrange + bf16 cast into the activation
            # operand (no extra HBM round trip for the transpose).
            allow_input_fusion=[True, False, False],
        ),
        cost_estimate=cost,
    )(x2d, w_p, bias2d_p)


# ---------------------------------------------------------------------------
# Module equivalent
# ---------------------------------------------------------------------------
class Input3dToEmbeddings:
    """JAX/Pallas port of the PyTorch Input3dToEmbeddings module."""

    def __init__(self, input_size, patch_size, in_channels, embed_dim, *, key,
                 compute_dtype=jnp.bfloat16):
        if isinstance(input_size, int):
            input_size = [input_size] * 3
        if isinstance(patch_size, int):
            patch_size = [patch_size] * 3
        assert len(input_size) == 3 and len(patch_size) == 3
        for i, p in zip(input_size, patch_size):
            assert i % p == 0
        self.input_size = list(input_size)
        self.patch_size = list(patch_size)
        self.in_channels = in_channels
        self.embed_dim = embed_dim
        self.compute_dtype = compute_dtype

        patch_dim = in_channels * patch_size[0] * patch_size[1] * patch_size[2]
        self.patch_dim = patch_dim

        kw, kb = jax.random.split(key)
        # Matches nn.Linear(patch_dim, embed_dim) shapes; stored as (K, E) so
        # the kernel computes x @ W directly.  Master copy stays f32.
        scale = 1.0 / (patch_dim ** 0.5)
        self.weight = jax.random.uniform(
            kw, (patch_dim, embed_dim), jnp.float32, minval=-scale, maxval=scale
        )
        self.bias = jax.random.uniform(
            kb, (embed_dim,), jnp.float32, minval=-scale, maxval=scale
        )

        # Pad embed dim to a multiple of 128 ONCE at init (lane-dense output,
        # no masked stores) and cast the weight to the compute dtype once.
        self.embed_dim_padded = max(128, _round_up(embed_dim, 128))
        ep = self.embed_dim_padded
        self._weight_p = jnp.pad(
            self.weight, ((0, 0), (0, ep - embed_dim))
        ).astype(compute_dtype)
        self._bias2d_p = jnp.pad(self.bias, (0, ep - embed_dim)).reshape(1, ep)

    @property
    def length(self):
        n = 1
        for i, p in zip(self.input_size, self.patch_size):
            n *= i // p
        return n

    def __call__(self, input_3d):
        # input_3d: (b, c, T, H, W)  -- PyTorch NCDHW layout.
        assert input_3d.ndim == 5
        b, c, T, H, W = input_3d.shape
        assert c == self.in_channels
        assert [T, H, W] == self.input_size
        p1, p2, p3 = self.patch_size
        t, h, w = T // p1, H // p2, W // p3

        # einops: 'b c (t p1) (h p2) (w p3) -> b (t h w) (p1 p2 p3 c)'
        # With allow_input_fusion this chain (plus the bf16 cast) is eligible
        # to fuse into the Pallas operand DMA instead of a separate HBM pass.
        x = input_3d.reshape(b, c, t, p1, h, p2, w, p3)
        x = jnp.transpose(x, (0, 2, 4, 6, 3, 5, 7, 1))  # b t h w p1 p2 p3 c

        M = b * t * h * w
        K = p1 * p2 * p3 * c
        x2d = x.reshape(M, K).astype(self.compute_dtype)

        # Generation-aware tile plan + VMEM limit.
        vmem_cap, is_v5e = _chip_caps()
        max_tile = 256 if is_v5e else 512
        budget = min((vmem_cap * 3) // 8, 48 << 20)   # ~24 MiB on v7x, 48 MiB on v5e/v6e
        tm, tn, tk = _plan_tiles(M, K, self.embed_dim_padded, budget, max_tile)
        blk = _block_bytes(tm, tn, tk, K // tk)
        vmem_limit = min(max(32 << 20, int(blk * 1.5)), vmem_cap)

        y2d = pallas_linear(x2d, self._weight_p, self._bias2d_p,
                            tm=tm, tn=tn, tk=tk, vmem_limit=vmem_limit)

        y2d = y2d[:, : self.embed_dim]
        return y2d.reshape(b, t * h * w, self.embed_dim)


# ---------------------------------------------------------------------------
# Pure-JAX reference for verification
# ---------------------------------------------------------------------------
def reference_forward(module, input_3d, operand_dtype=jnp.float32):
    b, c, T, H, W = input_3d.shape
    p1, p2, p3 = module.patch_size
    t, h, w = T // p1, H // p2, W // p3
    x = input_3d.reshape(b, c, t, p1, h, p2, w, p3)
    x = jnp.transpose(x, (0, 2, 4, 6, 3, 5, 7, 1))
    x = x.reshape(b, t * h * w, p1 * p2 * p3 * c)
    y = jnp.dot(x.astype(operand_dtype), module.weight.astype(operand_dtype),
                preferred_element_type=jnp.float32)
    return y + module.bias


if __name__ == "__main__":
    key = jax.random.PRNGKey(0)
    k_in, k_par = jax.random.split(key)

    batch, in_channels = 2, 4
    input_size = [8, 8, 8]
    patch_size = [2, 2, 2]
    embed_dim = 32

    module = Input3dToEmbeddings(
        input_size, patch_size, in_channels, embed_dim, key=k_par
    )

    x = jax.random.normal(
        k_in, (batch, in_channels, *input_size), dtype=jnp.float32
    )

    forward = jax.jit(lambda inp: module(inp))
    out = jax.block_until_ready(forward(x))

    assert out.shape == (batch, module.length, embed_dim), out.shape

    # Bit-compatible reference: bf16 operands, f32 accumulation.
    ref_bf16 = reference_forward(module, x, operand_dtype=jnp.bfloat16)
    assert jnp.allclose(out, ref_bf16, atol=1e-3, rtol=1e-3), "mismatch vs bf16 reference"

    # Loose sanity check against full-f32 math (bf16 operand rounding only).
    ref_f32 = reference_forward(module, x)
    assert jnp.allclose(out, ref_f32, atol=5e-2, rtol=5e-2), "mismatch vs f32 reference"

    print("KERNEL_OK")
</pallas_src>

<mosaic_0001>
module attributes {stable_mosaic.version = 11 : i64} {
  func.func @_linear_bias_kernel(%arg0: i32, %arg1: i32, %arg2: i32, %arg3: memref<64x32xbf16, #tpu.memory_space<vmem>>, %arg4: memref<32x128xbf16, #tpu.memory_space<vmem>>, %arg5: memref<1x128xf32, #tpu.memory_space<vmem>>, %arg6: memref<64x128xf32, #tpu.memory_space<vmem>>) attributes {dimension_semantics = [#tpu.dimension_semantics<parallel>, #tpu.dimension_semantics<parallel>, #tpu.dimension_semantics<arbitrary>], iteration_bounds = array<i64: 2, 1, 1>, scalar_prefetch = 0 : i64, scratch_operands = 0 : i64, tpu.core_type = #tpu.core_type<tc>, window_params = [{transform_indices = @transform_0, window_bounds = array<i64: 64, 32>}, {transform_indices = @transform_1, window_bounds = array<i64: 32, 128>}, {transform_indices = @transform_2, window_bounds = array<i64: 1, 128>}, {transform_indices = @transform_3, window_bounds = array<i64: 64, 128>}]} {
    %c0 = arith.constant 0 : index
    %c0_0 = arith.constant 0 : index
    %0 = vector.load %arg3[%c0, %c0_0] : memref<64x32xbf16, #tpu.memory_space<vmem>>, vector<64x32xbf16>
    %c0_1 = arith.constant 0 : index
    %c0_2 = arith.constant 0 : index
    %1 = vector.load %arg4[%c0_1, %c0_2] : memref<32x128xbf16, #tpu.memory_space<vmem>>, vector<32x128xbf16>
    %cst = arith.constant dense<0.000000e+00> : vector<64x128xf32>
    %2 = tpu.matmul %0, %1, %cst {dimension_numbers = #tpu.dot_dimension_numbers<[1], [0], [0], [1], [0, 0, 1, 1], [], []>} : vector<64x32xbf16>, vector<32x128xbf16>, vector<64x128xf32> -> vector<64x128xf32>
    %c0_3 = arith.constant 0 : index
    %c0_4 = arith.constant 0 : index
    %3 = vector.load %arg5[%c0_3, %c0_4] : memref<1x128xf32, #tpu.memory_space<vmem>>, vector<1x128xf32>
    %4 = vector.broadcast %3 : vector<1x128xf32> to vector<64x128xf32>
    %5 = arith.addf %2, %4 : vector<64x128xf32>
    %c0_5 = arith.constant 0 : index
    %c0_6 = arith.constant 0 : index
    %6 = vector.load %arg6[%c0_5, %c0_6] : memref<64x128xf32, #tpu.memory_space<vmem>>, vector<64x128xf32>
    tpu.vector_store %arg6[%c0_5, %c0_6], %5 {strides = array<i32>} : memref<64x128xf32, #tpu.memory_space<vmem>>, vector<64x128xf32>,
    return
  }
  func.func @transform_0(%arg0: i32, %arg1: i32, %arg2: i32) -> (i32, i32) {
    %c0_i32 = arith.constant 0 : i32
    return %arg0, %arg2 : i32, i32
  }
  func.func @transform_1(%arg0: i32, %arg1: i32, %arg2: i32) -> (i32, i32) {
    %c0_i32 = arith.constant 0 : i32
    return %arg2, %arg1 : i32, i32
  }
  func.func @transform_2(%arg0: i32, %arg1: i32, %arg2: i32) -> (i32, i32) {
    %c0_i32 = arith.constant 0 : i32
    %c0_i32_0 = arith.constant 0 : i32
    return %c0_i32, %arg1 : i32, i32
  }
  func.func @transform_3(%arg0: i32, %arg1: i32, %arg2: i32) -> (i32, i32) {
    %c0_i32 = arith.constant 0 : i32
    return %arg0, %arg1 : i32, i32
  }
}

</mosaic_0001>

<bundles_post_ra>
// kernel: _lambda_.1
= control target key start
LH: loop header
LB: loop body
LE: loop exit
PB: predicated region body
PF: predicated region fallthrough
CT: control target
= control target key end

     0   :  { %s628_s12 = smov 0   ;;  %s630_s13 = smov 0   ;;  %s670_s0 = inlined_call_operand.vmem [shape: bf16[128,32], index: 0, kind: input, shape index: {}]   ;;  %s671_s1 = inlined_call_operand.vmem [shape: bf16[32,128], index: 1, kind: input, shape index: {}]   ;;  %s672_s2 = inlined_call_operand.vmem [shape: f32[1,128], index: 2, kind: input, shape index: {}]   ;;  %s673_s3 = inlined_call_operand.vmem [shape: f32[128,128], index: 3, kind: output, shape index: {}]  }
   0x1   :  { %s632_s14 = smov 0  }
   0x2 LB: > { %s32_s15 = sadd.s32 1, %s602_s13  ;;  %p514_p0 = scmp.ge.s32.totalorder %s606_s14, 1  ;;  %s606_s14 = sphi %s632_s14, %s13_s14   ;;  %s602_s13 = sphi %s630_s13, %s675_s13   ;;  %s598_s12 = sphi %s628_s12, %s674_s12  }
   0x3   : > { %p34_p1 = scmp.ge.s32.totalorder %s32_s15, 2  ;;  %p188_p2 = scmp.lt.s32.totalorder %s606_s14, 3 }
   0x5   : > { %s677_s15 = smov (%p34_p1, %s32_s15), 0  ;;  %p189_p3 = pnand %p514_p0, %p188_p2 }
   0x6   : > { %v578_v0 = vld [vmem:[%s671_s1] sm:$0xff] (!%p189_p3)   ;;  %s515_s18 = sshll.u32 (!%p189_p3), %s598_s12, 3  ;;  %v579_v1 = vld [vmem:[%s671_s1 + $0x8] sm:$0xff] (!%p189_p3)   ;;  %vm311_vm0 = vcmask (!%p189_p3), 261120  }
   0x7   : > { %192 = sbr.rel (%p189_p3) target bundleno = 237 (0xed), region = 32  ;;  %p230_p4 = scmp.lt.s32.totalorder (!%p189_p3), %s515_s18, 15  ;;  %538 = vmatprep.subr.bf16.mxu0 (!%p189_p3), %v578_v0  ;;  %550 = vmatprep.subr.bf16.mxu1 (!%p189_p3), %v578_v0  ;;  %v519_v6 = vld [vmem:[%s672_s2] ss:$0 sm:$0xff] (!%p189_p3) }
   0x8   : > { %539 = vmatpush3.bf16.msra.mxu0 (!%p189_p3), %v578_v0  ;;  %552 = vmatpush3.bf16.msra.mxu1 (!%p189_p3), %v578_v0 }
   0x9   : > { %540 = vmatprep.subr.bf16.mxu0 (!%p189_p3), %v579_v1  ;;  %551 = vmatprep.subr.bf16.mxu1 (!%p189_p3), %v579_v1 }
   0xc   : > { %541 = vmatpush3.bf16.msra.mxu0 (!%p189_p3), %v579_v1  ;;  %553 = vmatpush3.bf16.msra.mxu1 (!%p189_p3), %v579_v1 }
   0xe   : > { %s679_s18 = smov (!%p230_p4, %s515_s18), 15 }
   0xf   : > { %s516_s21 = sshll.u32 %s679_s18, 2  ;;  %s518_s25 = sshll.u32 %s679_s18, 3 }
  0x10   : > { %s236_s24 = scalar_lea.vmem %s670_s0, %s516_s21  ;;  %s257_s30 = scalar_lea.vmem %s673_s3, %s518_s25 }
  0x11   : > { %v580_v2 = vld [vmem:[%s236_s24] sm:$0xff]   ;;  %v581_v3 = vld [vmem:[%s236_s24 + $0x10] sm:$0xff]   ;;  %v582_v4 = vld [vmem:[%s236_s24 + $0x8] sm:$0xff]  }
  0x12   : > { %542 = vmatprep.mubr.msk.bf16.mxu0 %vm311_vm0, %v580_v2  ;;  %546 = vmatprep.mubr.msk.bf16.mxu1 %vm311_vm0, %v581_v3  ;;  %v583_v5 = vld [vmem:[%s236_s24 + $0x18] sm:$0xff]  }
  0x13   : > { %543 = vmatmul.mubr.msk.bf16.vlgmr.msra.gmra.mrb[0].mxu0 %vm311_vm0, %v582_v4  ;;  %547 = vmatmul.mubr.msk.bf16.vlgmr.msra.gmra.mrb[0].mxu1 %vm311_vm0, %v583_v5 }
  0xe6   : > { %v544_v7 = vpop.f32.mrb[0].mxu0  ;;  %v548_v9 = vpop.f32.mrb[0].mxu1 }
  0xe7   : > { %v367_v8 = vadd.f32 %v544_v7, %v519_v6  ;;  %v358_v10 = vpop.f32.mrb[1].mxu0  ;;  %v383_v11 = vadd.f32 %v548_v9, %v519_v6  ;;  %v374_v13 = vpop.f32.mrb[1].mxu1 }
  0xe8   : > { %v359_v12 = vadd.f32 %v519_v6, %v358_v10  ;;  %v545_v14 = vpop.f32.mrb[2].mxu0  ;;  %v375_v15 = vadd.f32 %v519_v6, %v374_v13  ;;  %v549_v17 = vpop.f32.mrb[2].mxu1 }
  0xe9   : > { %391 = vst [vmem:[%s257_s30 + $0x10] sm:$0xff] %v367_v8  ;;  %v370_v16 = vadd.f32 %v545_v14, %v519_v6  ;;  %v361_v18 = vpop.f32.mrb[3].mxu0  ;;  %395 = vst [vmem:[%s257_s30 + $0x30] sm:$0xff] %v383_v11  ;;  %v386_v19 = vadd.f32 %v549_v17, %v519_v6  ;;  %v377_v21 = vpop.f32.mrb[3].mxu1 }
  0xea   : > { %389 = vst [vmem:[%s257_s30] sm:$0xff] %v359_v12  ;;  %v362_v20 = vadd.f32 %v519_v6, %v361_v18  ;;  %393 = vst [vmem:[%s257_s30 + $0x20] sm:$0xff] %v375_v15  ;;  %v378_v22 = vadd.f32 %v519_v6, %v377_v21 }
  0xeb   : > { %392 = vst [vmem:[%s257_s30 + $0x18] sm:$0xff] %v370_v16  ;;  %396 = vst [vmem:[%s257_s30 + $0x38] sm:$0xff] %v386_v19 }
  0xec   : > { %390 = vst [vmem:[%s257_s30 + $0x8] sm:$0xff] %v362_v20  ;;  %394 = vst [vmem:[%s257_s30 + $0x28] sm:$0xff] %v378_v22 }
  0xed PF: > { %s13_s14 = sadd.s32 1, %s606_s14   ;;  %s674_s12 = smov %s602_s13 }
  0xee   : > { %p10_p5 = scmp.ge.s32.totalorder %s13_s14, 4   ;;  %s675_s13 = smov %s677_s15 }
  0xf0   :  { %12 = sbr.rel (!%p10_p5) target bundleno = 2 (0x2), region = 68 }

</bundles_post_ra>
